<compile_context>
chip_gen: v7x
topology: tpu7x:2x2x1
jax: 0.10.0
libtpu: 0.0.40
codegen_flags: <defaults>
</compile_context>

<pallas_src>
import numpy as np
import jax
import jax.numpy as jnp
from jax.experimental import pallas as pl
from jax.experimental.pallas import tpu as pltpu

NODE_OF_INTEREST = 14   # NodeEmbeddingModule returns output_layer(h_v[14])
_NEG_BIG = -1e30        # finite "minus infinity" for masked logits (avoids inf-inf NaN)
_LANE = 128
_SUBLANE = 8


# ----------------------------- parameter slab packing -----------------------------

def _pack_slab(tensors):
    """Pack a list of 2-D f32 tensors into one (rows, 128k) slab.

    Each tensor starts at a row offset that is a multiple of 8 (sublane-tile
    aligned) and occupies lanes [0, cols).  Returns (slab, layout) where layout
    is a static tuple of (row_offset, rows, cols) in the same order.
    """
    width = max(int(np.ceil(t.shape[1] / _LANE)) for t in tensors) * _LANE
    layout = []
    rows = 0
    for t in tensors:
        r, c = t.shape
        layout.append((rows, int(r), int(c)))
        rows += int(np.ceil(r / _SUBLANE)) * _SUBLANE
    slab = np.zeros((rows, width), np.float32)
    for t, (off, r, c) in zip(tensors, layout):
        slab[off:off + r, :c] = np.asarray(t, np.float32)
    return jnp.asarray(slab), tuple(layout)


# ----------------------------- fused Pallas kernel -----------------------------

def make_ilgr_kernel(num_layers, layout):
    """Kernel fusing all GNN layers + (output_layer∘fc1) + fc2 + fc3."""

    def kernel(x_ref, adj_ref, slab_ref, out_ref):
        def read(i):
            off, r, c = layout[i]
            return slab_ref[off:off + r, :c]          # static slice: free view + load

        h = x_ref[...]                                 # (N, d0) f32, stays in VMEM
        adj = adj_ref[...]                             # (N, N)  0/1 f32
        mask = (adj > 0.0) if num_layers > 1 else None

        idx = 0
        h14 = None
        for l in range(num_layers):                    # unrolled: per-layer shapes differ
            w_att   = read(idx)                        # (d_in, d_hid)
            q_row   = read(idx + 1)                    # (1, d_hid)
            w_self  = read(idx + 2)                    # (d_in, d_out)  "h" half of concat weight
            w_neigh = read(idx + 3)                    # (d_in, d_out)  "h_N" half
            b_lin   = read(idx + 4)                    # (1, d_out)
            idx += 5

            # Attention logits s_j = q . relu(W_att h_j) for ALL nodes, in ROW form (1, N).
            hw = jnp.maximum(
                jnp.dot(h, w_att, preferred_element_type=jnp.float32), 0.0)   # (N, d_hid)
            s_row = jax.lax.dot_general(                                       # (1, N)
                q_row, hw,
                dimension_numbers=(((1,), (1,)), ((), ())),
                preferred_element_type=jnp.float32)

            last = (l == num_layers - 1)
            if not last:
                # Full per-node neighborhood softmax + aggregation (all rows).
                logits = jnp.where(mask, s_row, _NEG_BIG)            # (N, N)
                m = jnp.max(logits, axis=-1, keepdims=True)          # per-row masked max
                w = jnp.exp(logits - m) * adj                        # 0/1 adj replaces 2nd select
                denom = jnp.sum(w, axis=-1, keepdims=True)           # (N, 1)
                num = jnp.dot(w, h, preferred_element_type=jnp.float32)
                inv = pl.reciprocal(jnp.where(denom > 0.0, denom, 1.0), approx=True)
                h_n = num * inv                                      # isolated nodes -> zeros
                h = jnp.maximum(
                    jnp.dot(h, w_self, preferred_element_type=jnp.float32)
                    + jnp.dot(h_n, w_neigh, preferred_element_type=jnp.float32)
                    + b_lin,
                    0.0)
            else:
                # Only node 14 feeds the head: restrict the last layer to row 14.
                adj14 = adj[NODE_OF_INTEREST:NODE_OF_INTEREST + 1, :]           # (1, N)
                logits = jnp.where(adj14 > 0.0, s_row, _NEG_BIG)                # (1, N)
                m = jnp.max(logits, axis=-1, keepdims=True)                     # (1, 1)
                w = jnp.exp(logits - m) * adj14                                 # (1, N)
                denom = jnp.sum(w, axis=-1, keepdims=True)                      # (1, 1)
                num = jnp.dot(w, h, preferred_element_type=jnp.float32)         # (1, d_in)
                inv = pl.reciprocal(jnp.where(denom > 0.0, denom, 1.0), approx=True)
                h_n14 = num * inv
                h14_prev = h[NODE_OF_INTEREST:NODE_OF_INTEREST + 1, :]          # (1, d_in)
                h14 = jnp.maximum(
                    jnp.dot(h14_prev, w_self, preferred_element_type=jnp.float32)
                    + jnp.dot(h_n14, w_neigh, preferred_element_type=jnp.float32)
                    + b_lin,
                    0.0)                                                        # (1, d_out)

        # Head: (output_layer folded into fc1 offline) -> relu -> fc2 -> relu -> fc3
        w_fused = read(idx)      # (d_last, reg_hid)   = w_out.T @ w1.T
        b_fused = read(idx + 1)  # (1, reg_hid)        = b_out @ w1.T + b1
        w2      = read(idx + 2)  # (reg_hid, reg_hid//5)
        b2      = read(idx + 3)
        w3      = read(idx + 4)  # (reg_hid//5, 1)
        b3      = read(idx + 5)  # (1, 1)

        z = jnp.maximum(jnp.dot(h14, w_fused, preferred_element_type=jnp.float32) + b_fused, 0.0)
        z = jnp.maximum(jnp.dot(z, w2, preferred_element_type=jnp.float32) + b2, 0.0)
        out_ref[...] = jnp.dot(z, w3, preferred_element_type=jnp.float32) + b3

    return kernel


def make_forward(num_layers, layout):
    """Single jitted forward: one pallas_call, 3 inputs, everything VMEM-resident."""
    kernel = make_ilgr_kernel(num_layers, layout)
    vmem = pl.BlockSpec(memory_space=pltpu.MemorySpace.VMEM)
    call = pl.pallas_call(
        kernel,
        out_shape=jax.ShapeDtypeStruct((1, 1), jnp.float32),
        in_specs=[vmem, vmem, vmem],
        out_specs=vmem,
    )
    # TODO(synk): for many graphs, batch (B,N,d)/(B,N,N) with a leading parallel grid
    # axis (dimension_semantics=("parallel",)) to use both v7x TensorCores and amortize
    # launch overhead; for large N, row-tile adj with a BlockSpec grid and set
    # pltpu.CompilerParams(vmem_limit_bytes=...) (v5e scoped default 16 MiB, v7x 64 MiB phys).
    # TODO(synk): optionally store GNN weights/adj as bf16 for v6e/v7x MXUs (keep softmax f32).

    @jax.jit
    def forward(X_v, adj, slab):
        out = call(X_v, adj, slab)
        return out[0, 0]     # .squeeze() in the PyTorch module

    return forward


# ----------------------------- parameter handling -----------------------------

def init_params(key, input_dim, hidden_dim, output_dim, num_layers):
    """Parameters in PyTorch layout (out_features, in_features)."""
    def lin(key, out_f, in_f, scale=0.1):
        k1, k2 = jax.random.split(key)
        w = scale * jax.random.normal(k1, (out_f, in_f), jnp.float32)
        b = scale * jax.random.normal(k2, (out_f,), jnp.float32)
        return w, b

    params = {"layers": []}
    for l in range(num_layers):
        d_in = input_dim // 2 ** l
        d_hid = hidden_dim // 2 ** l
        key, k1, k2, k3 = jax.random.split(key, 4)
        w_att = 0.1 * jax.random.normal(k1, (d_hid, d_in), jnp.float32)   # AttentionLayer.W
        q_att = 0.1 * jax.random.normal(k2, (1, d_hid), jnp.float32)      # AttentionLayer.q
        w_lin, b_lin = lin(k3, d_hid, 2 * d_in)                           # layers[l]
        params["layers"].append((w_att, q_att, w_lin, b_lin))

    d_last = hidden_dim // 2 ** (num_layers - 1)
    key, k1, k2, k3, k4 = jax.random.split(key, 5)
    params["w_out"], params["b_out"] = lin(k1, output_dim, d_last)        # output_layer
    reg_hid = output_dim // 2
    params["w1"], params["b1"] = lin(k2, reg_hid, output_dim)             # fc1
    params["w2"], params["b2"] = lin(k3, reg_hid // 5, reg_hid)           # fc2
    params["w3"], params["b3"] = lin(k4, 1, reg_hid // 5)                 # fc3
    return params


def prepare_params(params):
    """One-time conversion: transpose/split/fold and pack everything into ONE slab."""
    f = lambda a: np.asarray(a, np.float32)
    tensors = []
    for (w_att, q_att, w_lin, b_lin) in params["layers"]:
        d_in = w_att.shape[1]
        tensors += [
            f(w_att).T,                  # (d_in, d_hid): kernel does h @ w_att
            f(q_att),                    # (1, d_hid)    row form for the logit dot
            f(w_lin)[:, :d_in].T,        # (d_in, d_out) self half of concat weight
            f(w_lin)[:, d_in:].T,        # (d_in, d_out) neighbor half
            f(b_lin).reshape(1, -1),
        ]
    # Fold output_layer into fc1 (no activation between them).
    W_out = f(params["w_out"]).T                                     # (d_last, output_dim)
    W1 = f(params["w1"]).T                                           # (output_dim, reg_hid)
    w_fused = W_out @ W1                                             # (d_last, reg_hid)
    b_fused = f(params["b_out"]).reshape(1, -1) @ W1 + f(params["b1"]).reshape(1, -1)
    tensors += [
        w_fused, b_fused,
        f(params["w2"]).T, f(params["b2"]).reshape(1, -1),
        f(params["w3"]).T, f(params["b3"]).reshape(1, -1),
    ]
    return _pack_slab(tensors)


# ----------------------------- numpy reference (spec semantics) ---------------

def reference_forward_np(X_v, adj, params):
    f64 = lambda a: np.asarray(a, np.float64)
    h = f64(X_v)
    A = np.asarray(adj)
    for (w_att, q_att, w_lin, b_lin) in params["layers"]:
        W, q = f64(w_att), f64(q_att)
        WL, bL = f64(w_lin), f64(b_lin)
        h_N = np.zeros_like(h)
        for v in range(h.shape[0]):
            nbrs = np.nonzero(A[v] > 0)[0]
            if nbrs.size == 0:
                continue                                   # torch.zeros_like branch
            ne = h[nbrs]                                    # (k, d)
            sc = np.maximum(ne @ W.T, 0.0) @ q.T            # (k, 1)
            e = np.exp(sc - sc.max())
            wgt = e / e.sum()                               # softmax over neighbors (dim=0)
            h_N[v] = (wgt * ne).sum(axis=0)
        h = np.maximum(np.concatenate([h, h_N], axis=1) @ WL.T + bL, 0.0)
    emb = h[NODE_OF_INTEREST] @ f64(params["w_out"]).T + f64(params["b_out"])
    x = np.maximum(emb @ f64(params["w1"]).T + f64(params["b1"]), 0.0)
    x = np.maximum(x @ f64(params["w2"]).T + f64(params["b2"]), 0.0)
    out = x @ f64(params["w3"]).T + f64(params["b3"])
    return float(out[0])


# ----------------------------- main -----------------------------

if __name__ == "__main__":
    # Small shapes consistent with the module (the forward loop implicitly requires
    # hidden_dim == input_dim // 2; output_dim >= 10 so fc2 has >= 1 unit).
    N = 16            # number of graph nodes (node 14 must exist)
    input_dim = 32
    hidden_dim = 16
    output_dim = 20
    num_layers = 2

    key = jax.random.PRNGKey(0)
    key, kx = jax.random.split(key)
    X_v = jax.random.normal(kx, (N, input_dim), jnp.float32)

    # Deterministic graph: ring over nodes 0..13, node 14 attached to 0 and 7,
    # node 15 isolated (exercises the "no neighbors -> zeros" branch).
    adj_np = np.zeros((N, N), dtype=np.float32)
    for i in range(14):
        j = (i + 1) % 14
        adj_np[i, j] = 1.0
        adj_np[j, i] = 1.0
    for j in (0, 7):
        adj_np[14, j] = 1.0
        adj_np[j, 14] = 1.0
    adj = jnp.asarray(adj_np)

    params = init_params(key, input_dim, hidden_dim, output_dim, num_layers)
    slab, layout = prepare_params(params)       # one-time weight packing (off hot path)
    forward = make_forward(num_layers, layout)  # single fused, jitted pallas_call

    score = forward(X_v, adj, slab)
    jax.block_until_ready(score)

    ref = reference_forward_np(np.asarray(X_v), adj_np, params)
    assert score.shape == () and np.isfinite(float(score))
    # f64 reference vs f32 kernel (default-precision MXU + approx reciprocal).
    assert abs(float(score) - ref) <= 5e-3 + 5e-3 * abs(ref), (float(score), ref)
    print("KERNEL_OK")
</pallas_src>

<mosaic_0001>
module attributes {stable_mosaic.version = 11 : i64} {
  func.func @kernel(%arg0: memref<16x32xf32, #tpu.memory_space<vmem>>, %arg1: memref<16x16xf32, #tpu.memory_space<vmem>>, %arg2: memref<232x128xf32, #tpu.memory_space<vmem>>, %arg3: memref<1x1xf32, #tpu.memory_space<vmem>>) attributes {dimension_semantics = [], scalar_prefetch = 0 : i64, scratch_operands = 0 : i64, tpu.core_type = #tpu.core_type<tc>} {
    %c0 = arith.constant 0 : index
    %c0_0 = arith.constant 0 : index
    %0 = vector.load %arg0[%c0, %c0_0] : memref<16x32xf32, #tpu.memory_space<vmem>>, vector<16x32xf32>
    %c0_1 = arith.constant 0 : index
    %c0_2 = arith.constant 0 : index
    %1 = vector.load %arg1[%c0_1, %c0_2] : memref<16x16xf32, #tpu.memory_space<vmem>>, vector<16x16xf32>
    %cst = arith.constant 0.000000e+00 : f32
    %2 = vector.broadcast %cst : f32 to vector<16x16xf32>
    %3 = arith.cmpf ogt, %1, %2 : vector<16x16xf32>
    %c0_3 = arith.constant 0 : index
    %c0_4 = arith.constant 0 : index
    %4 = vector.load %arg2[%c0_3, %c0_4] : memref<232x128xf32, #tpu.memory_space<vmem>>, vector<32x16xf32>
    %c32 = arith.constant 32 : index
    %c0_5 = arith.constant 0 : index
    %5 = vector.load %arg2[%c32, %c0_5] : memref<232x128xf32, #tpu.memory_space<vmem>>, vector<1x16xf32>
    %c40 = arith.constant 40 : index
    %c0_6 = arith.constant 0 : index
    %6 = vector.load %arg2[%c40, %c0_6] : memref<232x128xf32, #tpu.memory_space<vmem>>, vector<32x16xf32>
    %c72 = arith.constant 72 : index
    %c0_7 = arith.constant 0 : index
    %7 = vector.load %arg2[%c72, %c0_7] : memref<232x128xf32, #tpu.memory_space<vmem>>, vector<32x16xf32>
    %c104 = arith.constant 104 : index
    %c0_8 = arith.constant 0 : index
    %8 = vector.load %arg2[%c104, %c0_8] : memref<232x128xf32, #tpu.memory_space<vmem>>, vector<1x16xf32>
    %cst_9 = arith.constant dense<0.000000e+00> : vector<16x16xf32>
    %9 = tpu.matmul %0, %4, %cst_9 {dimension_numbers = #tpu.dot_dimension_numbers<[1], [0], [0], [1], [0, 0, 1, 1], [], []>} : vector<16x32xf32>, vector<32x16xf32>, vector<16x16xf32> -> vector<16x16xf32>
    %cst_10 = arith.constant 0.000000e+00 : f32
    %10 = vector.broadcast %cst_10 : f32 to vector<16x16xf32>
    %11 = arith.maximumf %9, %10 : vector<16x16xf32>
    %cst_11 = arith.constant dense<0.000000e+00> : vector<1x16xf32>
    %12 = tpu.matmul %5, %11, %cst_11 {dimension_numbers = #tpu.dot_dimension_numbers<[1], [1], [0], [0], [0, 0, 1, 0], [], []>} : vector<1x16xf32>, vector<16x16xf32>, vector<1x16xf32> -> vector<1x16xf32>
    %cst_12 = arith.constant -1.000000e+30 : f32
    %13 = vector.shape_cast %12 : vector<1x16xf32> to vector<1x16xf32>
    %14 = vector.broadcast %13 : vector<1x16xf32> to vector<16x16xf32>
    %15 = vector.broadcast %cst_12 : f32 to vector<16x16xf32>
    %16 = arith.select %3, %14, %15 : vector<16x16xi1>, vector<16x16xf32>
    %cst_13 = arith.constant dense<0xFF800000> : vector<16xf32>
    %17 = vector.multi_reduction <maximumf>, %16, %cst_13 [1] : vector<16x16xf32> to vector<16xf32>
    %18 = vector.shape_cast %17 : vector<16xf32> to vector<16x1xf32>
    %19 = vector.broadcast %18 : vector<16x1xf32> to vector<16x16xf32>
    %20 = arith.subf %16, %19 : vector<16x16xf32>
    %21 = math.exp %20 : vector<16x16xf32>
    %22 = arith.mulf %21, %1 : vector<16x16xf32>
    %cst_14 = arith.constant dense<0.000000e+00> : vector<16xf32>
    %23 = vector.multi_reduction <add>, %22, %cst_14 [1] : vector<16x16xf32> to vector<16xf32>
    %24 = vector.shape_cast %23 : vector<16xf32> to vector<16x1xf32>
    %cst_15 = arith.constant dense<0.000000e+00> : vector<16x32xf32>
    %25 = tpu.matmul %22, %0, %cst_15 {dimension_numbers = #tpu.dot_dimension_numbers<[1], [0], [0], [1], [0, 0, 1, 1], [], []>} : vector<16x16xf32>, vector<16x32xf32>, vector<16x32xf32> -> vector<16x32xf32>
    %cst_16 = arith.constant 0.000000e+00 : f32
    %26 = vector.broadcast %cst_16 : f32 to vector<16x1xf32>
    %27 = arith.cmpf ogt, %24, %26 : vector<16x1xf32>
    %cst_17 = arith.constant 1.000000e+00 : f32
    %28 = vector.broadcast %cst_17 : f32 to vector<16x1xf32>
    %29 = arith.select %27, %24, %28 : vector<16x1xi1>, vector<16x1xf32>
    %30 = tpu.reciprocal %29 {approx = true} : vector<16x1xf32> -> vector<16x1xf32>
    %31 = vector.broadcast %30 : vector<16x1xf32> to vector<16x32xf32>
    %32 = arith.mulf %25, %31 : vector<16x32xf32>
    %cst_18 = arith.constant dense<0.000000e+00> : vector<16x16xf32>
    %33 = tpu.matmul %0, %6, %cst_18 {dimension_numbers = #tpu.dot_dimension_numbers<[1], [0], [0], [1], [0, 0, 1, 1], [], []>} : vector<16x32xf32>, vector<32x16xf32>, vector<16x16xf32> -> vector<16x16xf32>
    %cst_19 = arith.constant dense<0.000000e+00> : vector<16x16xf32>
    %34 = tpu.matmul %32, %7, %cst_19 {dimension_numbers = #tpu.dot_dimension_numbers<[1], [0], [0], [1], [0, 0, 1, 1], [], []>} : vector<16x32xf32>, vector<32x16xf32>, vector<16x16xf32> -> vector<16x16xf32>
    %35 = arith.addf %33, %34 : vector<16x16xf32>
    %36 = vector.broadcast %8 : vector<1x16xf32> to vector<16x16xf32>
    %37 = arith.addf %35, %36 : vector<16x16xf32>
    %cst_20 = arith.constant 0.000000e+00 : f32
    %38 = vector.broadcast %cst_20 : f32 to vector<16x16xf32>
    %39 = arith.maximumf %37, %38 : vector<16x16xf32>
    %c112 = arith.constant 112 : index
    %c0_21 = arith.constant 0 : index
    %40 = vector.load %arg2[%c112, %c0_21] : memref<232x128xf32, #tpu.memory_space<vmem>>, vector<16x8xf32>
    %c128 = arith.constant 128 : index
    %c0_22 = arith.constant 0 : index
    %41 = vector.load %arg2[%c128, %c0_22] : memref<232x128xf32, #tpu.memory_space<vmem>>, vector<1x8xf32>
    %c136 = arith.constant 136 : index
    %c0_23 = arith.constant 0 : index
    %42 = vector.load %arg2[%c136, %c0_23] : memref<232x128xf32, #tpu.memory_space<vmem>>, vector<16x8xf32>
    %c152 = arith.constant 152 : index
    %c0_24 = arith.constant 0 : index
    %43 = vector.load %arg2[%c152, %c0_24] : memref<232x128xf32, #tpu.memory_space<vmem>>, vector<16x8xf32>
    %c168 = arith.constant 168 : index
    %c0_25 = arith.constant 0 : index
    %44 = vector.load %arg2[%c168, %c0_25] : memref<232x128xf32, #tpu.memory_space<vmem>>, vector<1x8xf32>
    %cst_26 = arith.constant dense<0.000000e+00> : vector<16x8xf32>
    %45 = tpu.matmul %39, %40, %cst_26 {dimension_numbers = #tpu.dot_dimension_numbers<[1], [0], [0], [1], [0, 0, 1, 1], [], []>} : vector<16x16xf32>, vector<16x8xf32>, vector<16x8xf32> -> vector<16x8xf32>
    %cst_27 = arith.constant 0.000000e+00 : f32
    %46 = vector.broadcast %cst_27 : f32 to vector<16x8xf32>
    %47 = arith.maximumf %45, %46 : vector<16x8xf32>
    %cst_28 = arith.constant dense<0.000000e+00> : vector<1x16xf32>
    %48 = tpu.matmul %41, %47, %cst_28 {dimension_numbers = #tpu.dot_dimension_numbers<[1], [1], [0], [0], [0, 0, 1, 0], [], []>} : vector<1x8xf32>, vector<16x8xf32>, vector<1x16xf32> -> vector<1x16xf32>
    %49 = vector.extract_strided_slice %1 {offsets = [14, 0], sizes = [1, 16], strides = [1, 1]} : vector<16x16xf32> to vector<1x16xf32>
    %cst_29 = arith.constant 0.000000e+00 : f32
    %50 = vector.broadcast %cst_29 : f32 to vector<1x16xf32>
    %51 = arith.cmpf ogt, %49, %50 : vector<1x16xf32>
    %cst_30 = arith.constant -1.000000e+30 : f32
    %52 = vector.broadcast %cst_30 : f32 to vector<1x16xf32>
    %53 = arith.select %51, %48, %52 : vector<1x16xi1>, vector<1x16xf32>
    %cst_31 = arith.constant dense<0xFF800000> : vector<1xf32>
    %54 = vector.multi_reduction <maximumf>, %53, %cst_31 [1] : vector<1x16xf32> to vector<1xf32>
    %55 = vector.shape_cast %54 : vector<1xf32> to vector<1x1xf32>
    %56 = vector.broadcast %55 : vector<1x1xf32> to vector<1x16xf32>
    %57 = arith.subf %53, %56 : vector<1x16xf32>
    %58 = math.exp %57 : vector<1x16xf32>
    %59 = arith.mulf %58, %49 : vector<1x16xf32>
    %cst_32 = arith.constant dense<0.000000e+00> : vector<1xf32>
    %60 = vector.multi_reduction <add>, %59, %cst_32 [1] : vector<1x16xf32> to vector<1xf32>
    %61 = vector.shape_cast %60 : vector<1xf32> to vector<1x1xf32>
    %cst_33 = arith.constant dense<0.000000e+00> : vector<1x16xf32>
    %62 = tpu.matmul %59, %39, %cst_33 {dimension_numbers = #tpu.dot_dimension_numbers<[1], [0], [0], [1], [0, 0, 1, 1], [], []>} : vector<1x16xf32>, vector<16x16xf32>, vector<1x16xf32> -> vector<1x16xf32>
    %cst_34 = arith.constant 0.000000e+00 : f32
    %63 = vector.broadcast %cst_34 : f32 to vector<1x1xf32>
    %64 = arith.cmpf ogt, %61, %63 : vector<1x1xf32>
    %cst_35 = arith.constant 1.000000e+00 : f32
    %65 = vector.broadcast %cst_35 : f32 to vector<1x1xf32>
    %66 = arith.select %64, %61, %65 : vector<1x1xi1>, vector<1x1xf32>
    %67 = tpu.reciprocal %66 {approx = true} : vector<1x1xf32> -> vector<1x1xf32>
    %68 = vector.broadcast %67 : vector<1x1xf32> to vector<1x16xf32>
    %69 = arith.mulf %62, %68 : vector<1x16xf32>
    %70 = vector.extract_strided_slice %39 {offsets = [14, 0], sizes = [1, 16], strides = [1, 1]} : vector<16x16xf32> to vector<1x16xf32>
    %cst_36 = arith.constant dense<0.000000e+00> : vector<1x8xf32>
    %71 = tpu.matmul %70, %42, %cst_36 {dimension_numbers = #tpu.dot_dimension_numbers<[1], [0], [0], [1], [0, 0, 1, 1], [], []>} : vector<1x16xf32>, vector<16x8xf32>, vector<1x8xf32> -> vector<1x8xf32>
    %cst_37 = arith.constant dense<0.000000e+00> : vector<1x8xf32>
    %72 = tpu.matmul %69, %43, %cst_37 {dimension_numbers = #tpu.dot_dimension_numbers<[1], [0], [0], [1], [0, 0, 1, 1], [], []>} : vector<1x16xf32>, vector<16x8xf32>, vector<1x8xf32> -> vector<1x8xf32>
    %73 = arith.addf %71, %72 : vector<1x8xf32>
    %74 = arith.addf %73, %44 : vector<1x8xf32>
    %cst_38 = arith.constant 0.000000e+00 : f32
    %75 = vector.broadcast %cst_38 : f32 to vector<1x8xf32>
    %76 = arith.maximumf %74, %75 : vector<1x8xf32>
    %c176 = arith.constant 176 : index
    %c0_39 = arith.constant 0 : index
    %77 = vector.load %arg2[%c176, %c0_39] : memref<232x128xf32, #tpu.memory_space<vmem>>, vector<8x10xf32>
    %c184 = arith.constant 184 : index
    %c0_40 = arith.constant 0 : index
    %78 = vector.load %arg2[%c184, %c0_40] : memref<232x128xf32, #tpu.memory_space<vmem>>, vector<1x10xf32>
    %c192 = arith.constant 192 : index
    %c0_41 = arith.constant 0 : index
    %79 = vector.load %arg2[%c192, %c0_41] : memref<232x128xf32, #tpu.memory_space<vmem>>, vector<10x2xf32>
    %c208 = arith.constant 208 : index
    %c0_42 = arith.constant 0 : index
    %80 = vector.load %arg2[%c208, %c0_42] : memref<232x128xf32, #tpu.memory_space<vmem>>, vector<1x2xf32>
    %c216 = arith.constant 216 : index
    %c0_43 = arith.constant 0 : index
    %81 = vector.load %arg2[%c216, %c0_43] : memref<232x128xf32, #tpu.memory_space<vmem>>, vector<2x1xf32>
    %c224 = arith.constant 224 : index
    %c0_44 = arith.constant 0 : index
    %82 = vector.load %arg2[%c224, %c0_44] : memref<232x128xf32, #tpu.memory_space<vmem>>, vector<1x1xf32>
    %cst_45 = arith.constant dense<0.000000e+00> : vector<1x10xf32>
    %83 = tpu.matmul %76, %77, %cst_45 {dimension_numbers = #tpu.dot_dimension_numbers<[1], [0], [0], [1], [0, 0, 1, 1], [], []>} : vector<1x8xf32>, vector<8x10xf32>, vector<1x10xf32> -> vector<1x10xf32>
    %84 = arith.addf %83, %78 : vector<1x10xf32>
    %cst_46 = arith.constant 0.000000e+00 : f32
    %85 = vector.broadcast %cst_46 : f32 to vector<1x10xf32>
    %86 = arith.maximumf %84, %85 : vector<1x10xf32>
    %cst_47 = arith.constant dense<0.000000e+00> : vector<1x2xf32>
    %87 = tpu.matmul %86, %79, %cst_47 {dimension_numbers = #tpu.dot_dimension_numbers<[1], [0], [0], [1], [0, 0, 1, 1], [], []>} : vector<1x10xf32>, vector<10x2xf32>, vector<1x2xf32> -> vector<1x2xf32>
    %88 = arith.addf %87, %80 : vector<1x2xf32>
    %cst_48 = arith.constant 0.000000e+00 : f32
    %89 = vector.broadcast %cst_48 : f32 to vector<1x2xf32>
    %90 = arith.maximumf %88, %89 : vector<1x2xf32>
    %cst_49 = arith.constant dense<0.000000e+00> : vector<1x1xf32>
    %91 = tpu.matmul %90, %81, %cst_49 {dimension_numbers = #tpu.dot_dimension_numbers<[1], [0], [0], [1], [0, 0, 1, 1], [], []>} : vector<1x2xf32>, vector<2x1xf32>, vector<1x1xf32> -> vector<1x1xf32>
    %92 = arith.addf %91, %82 : vector<1x1xf32>
    %c0_50 = arith.constant 0 : index
    %c0_51 = arith.constant 0 : index
    %93 = vector.load %arg3[%c0_50, %c0_51] : memref<1x1xf32, #tpu.memory_space<vmem>>, vector<1x1xf32>
    tpu.vector_store %arg3[%c0_50, %c0_51], %92 {strides = array<i32>} : memref<1x1xf32, #tpu.memory_space<vmem>>, vector<1x1xf32>,
    return
  }
}

</mosaic_0001>

<bundles_post_ra>
// kernel: forward.1
= control target key start
LH: loop header
LB: loop body
LE: loop exit
PB: predicated region body
PF: predicated region fallthrough
CT: control target
= control target key end

     0   :  { %8 = vsyncpa [#allocation3], 0  ;;  %s1693_s0 = inlined_call_operand.hbm [shape: f32[16,32], index: 0, kind: input, shape index: {}]   ;;  %s1694_s1 = inlined_call_operand.hbm [shape: f32[16,16], index: 1, kind: input, shape index: {}]   ;;  %s1695_s2 = inlined_call_operand.hbm [shape: f32[232,128], index: 2, kind: input, shape index: {}]   ;;  %s1696_s3 = inlined_call_operand.hbm [shape: f32[1,1], index: 3, kind: output, shape index: {}]  }
   0x1   :  { %9 = vsyncpa [#allocation6], 0 }
   0x2   :  { %10 = vsyncpa [#allocation4], 0  ;;  %s1532_s12 = smov [#allocation5]   ;;  %s1533_s14 = smov [#allocation2]  }
   0x3   :  { %s28_s13 = sshll.u32 %s1532_s12, 4  ;;  %s16_s15 = sshll.u32 %s1533_s14, 4  ;;  %s29_s13 = int_to_ptr.vmem [resolvable:$true] %s28_s13  ;;  %s1562_s15 = int_to_ptr.vmem [resolvable:$true] %s16_s15 }
   0x4   :  { %s1438_s18 = scalar_lea.hbm %s1694_s1, 256 }
   0x5   :  { %p1439_p0 = scmp.ne.s32.totalorder %s1694_s1, %s1438_s18  ;;  %p1442_p1 = scmp.lt.u32.totalorder %s1438_s18, %s1694_s1 }
   0x7   :  { %p1444_p2 = pnand %p1442_p1, %p1439_p0 }
   0x9   :  { %1447 = shalt.err (!%p1444_p2)
}
   0xa   :  { %s1448_s23 = scalar_lea.vmem %s29_s13, 256  ;;  %p1453_p4 = scmp.lt.s32.totalorder %s29_s13, %s29_s13 }
   0xb   :  { %p1449_p3 = scmp.ne.s32.totalorder %s29_s13, %s1448_s23  ;;  %p1454_p5 = scmp.lt.s32.totalorder %s1448_s23, %s1448_s23 }
   0xd   :  { %p1455_p6 = por %p1454_p5, %p1453_p4 }
   0xf   :  { %p1456_p7 = pnand %p1455_p6, %p1449_p3 }
  0x11   :  { %1459 = shalt.err (!%p1456_p7)
}
  0x12   :  { %s1534_s24 = smov 128   ;;  %s1535_s25 = smov 8  }
  0x13   :  { %34 = dma.hbm_to_vmem [thread:$0]  %s1694_s1, 256, %s29_s13, [#allocation6], %s1534_s24, %s1534_s24, %s1535_s25  }
  0x14   :  { %s1460_s30 = scalar_lea.hbm %s1693_s0, 256 }
  0x15   :  { %p1461_p8 = scmp.ne.s32.totalorder %s1693_s0, %s1460_s30  ;;  %p1464_p9 = scmp.lt.u32.totalorder %s1460_s30, %s1693_s0 }
  0x17   :  { %p1466_p10 = pnand %p1464_p9, %p1461_p8 }
  0x19   :  { %1469 = shalt.err (!%p1466_p10)
}
  0x1a   :  { %s1470_s8 = scalar_lea.vmem %s1562_s15, 256  ;;  %p1475_p12 = scmp.lt.s32.totalorder %s1562_s15, %s1562_s15 }
  0x1b   :  { %p1471_p11 = scmp.ne.s32.totalorder %s1562_s15, %s1470_s8  ;;  %p1476_p13 = scmp.lt.s32.totalorder %s1470_s8, %s1470_s8 }
  0x1d   :  { %p1477_p0 = por %p1476_p13, %p1475_p12 }
  0x1f   :  { %p1478_p1 = pnand %p1477_p0, %p1471_p11 }
  0x21   :  { %1481 = shalt.err (!%p1478_p1)
}
  0x22   :  { %22 = dma.hbm_to_vmem [thread:$0]  %s1693_s0, 256, %s1562_s15, [#allocation3], %s1534_s24, %s1534_s24, %s1535_s25  }
  0x23   :  { %s1536_s10 = smov [#allocation7]   ;;  %s1482_s14 = scalar_lea.hbm %s1695_s2, 3712 }
  0x24   :  { %s40_s11 = sshll.u32 %s1536_s10, 4  ;;  %p1483_p2 = scmp.ne.s32.totalorder %s1695_s2, %s1482_s14  ;;  %s41_s11 = int_to_ptr.vmem [resolvable:$true] %s40_s11 }
  0x25   :  { %p1486_p3 = scmp.lt.u32.totalorder %s1482_s14, %s1695_s2 }
  0x27   :  { %p1488_p4 = pnand %p1486_p3, %p1483_p2 }
  0x29   :  { %1491 = shalt.err (!%p1488_p4)
}
  0x2a   :  { %s1492_s20 = scalar_lea.vmem %s41_s11, 3712  ;;  %p1497_p6 = scmp.lt.s32.totalorder %s41_s11, %s41_s11 }
  0x2b   :  { %p1493_p5 = scmp.ne.s32.totalorder %s41_s11, %s1492_s20  ;;  %p1498_p7 = scmp.lt.s32.totalorder %s1492_s20, %s1492_s20 }
  0x2d   :  { %p1499_p8 = por %p1498_p7, %p1497_p6 }
  0x2f   :  { %p1500_p9 = pnand %p1499_p8, %p1493_p5 }
  0x31   :  { %1503 = shalt.err (!%p1500_p9)
}
  0x32   :  { %46 = dma.hbm_to_vmem [thread:$0]  %s1695_s2, 3712, %s41_s11, [#allocation6], %s1534_s24, %s1534_s24, %s1535_s25  }
  0x33   :  { %1526 = dma.done.wait [#allocation3], 256  }
  0x34   :  { %1527 = vsyncadd [#allocation3], 4294967040 }
  0x35   :  { %1528 = dma.done.wait [#allocation6], 3968  }
  0x36   :  { %1529 = vsyncadd [#allocation6], 4294963328  ;;  %vm76_vm0 = vcmask 261120   ;;  %v62_v0 = vld [vmem:[#allocation7] sm:$0xff]  ;;  %v63_v1 = vld [vmem:[#allocation7 + $0x8] sm:$0xff]  ;;  %v1537_v8 = vmov 0.0|0.0   ;;  %v240_v16 = vlaneseq }
  0x37   :  { %v64_v2 = vld [vmem:[#allocation7 + $0x10] sm:$0xff]  ;;  %v1361_v3 = vpack.c.bf16 %v63_v1, %v62_v0  ;;  %v65_v4 = vld [vmem:[#allocation7 + $0x18] sm:$0xff]  ;;  %v1614_v5 = vld [vmem:[#allocation2] sm:$0xff]  ;;  %1369 = vmatprep.subr.bf16.mxu1 %v1537_v8  ;;  %vm1538_vm1 = vmmov 0   ;;  %v1539_v9 = vmov 0.0   ;;  %vm160_vm2 = vcmask 130048  }
  0x38   :  { %v1365_v6 = vpack.c.bf16 %v65_v4, %v64_v2  ;;  %1270 = vmatprep.mubr.msk.f32.mxu0 %vm76_vm0, %v1614_v5  ;;  %v1618_v7 = vld [vmem:[#allocation2 + $0x8] sm:$0xff]  ;;  %1277 = vmatprep.mubr.msk.f32.mxu1 %vm1538_vm1, %v1539_v9  ;;  %vm1371_vm3 = vmpackc.low %vm160_vm2, %vm160_vm2  ;;  %v66_v15 = vld [vmem:[#allocation7 + $0x20] sm:$0x1]  ;;  %v241_v17 = vshrl.u32 %v240_v16, 7  ;;  %vm610_vm8 = vcmask 64512   ;;  %vm694_vm10 = vcmask 129030  }
  0x39   :  { %1362 = vmatprep.subr.bf16.mxu0 %v1361_v3  ;;  %v58_v19 = vld [vmem:[#allocation5] sm:$0xff]  ;;  %v1628_v20 = vld [vmem:[#allocation5 + $0x8] sm:$0xff]  ;;  %v1373_v28 = vpack.c.bf16 %v1618_v7, %v1614_v5  ;;  %v71_v41 = vld [vmem:[#allocation7 + $0x48] sm:$0xff]  ;;  %vm1019_vm12 = vcmask 1041408   ;;  %vm1540_vm13 = vmmov 1   ;;  %vm1015_vm15 = vcmask 80896  }
  0x3a   :  { %1364 = vmatpush3.bf16.msra.mxu0 %v1361_v3  ;;  %v242_v18 = vsub.s32 0, %v241_v17  ;;  %vm60_vm4 = vcmp.gt.f32.partialorder %v58_v19, 0.0  ;;  %vm61_vm5 = vcmp.gt.f32.partialorder %v1628_v20, 0.0  ;;  %v72_v42 = vld [vmem:[#allocation7 + $0x50] sm:$0xff]  ;;  %v73_v44 = vld [vmem:[#allocation7 + $0x58] sm:$0xff]  ;;  %v74_v45 = vld [vmem:[#allocation7 + $0x60] sm:$0xff] }
  0x3b   :  { %1366 = vmatprep.subr.bf16.mxu0 %v1365_v6  ;;  %v1377_v43 = vpack.c.bf16 %v72_v42, %v71_v41  ;;  %v1381_v46 = vpack.c.bf16 %v74_v45, %v73_v44  ;;  %v67_v47 = vld [vmem:[#allocation7 + $0x28] sm:$0xff]  ;;  %v68_v48 = vld [vmem:[#allocation7 + $0x30] sm:$0xff]  ;;  %v69_v55 = vld [vmem:[#allocation7 + $0x38] sm:$0xff]  ;;  %s1541_s2 = smov [#allocation8]  }
  0x3c   :  { %v1385_v49 = vpack.c.bf16 %v68_v48, %v67_v47  ;;  %v70_v56 = vld [vmem:[#allocation7 + $0x40] sm:$0xff]  ;;  %v519_v63 = vld [vmem:[#allocation7 + $0x70] sm:$0xff]  ;;  %v520_v0 = vld [vmem:[#allocation7 + $0x78] sm:$0xff]  ;;  %s1179_s21 = sshll.u32 %s1541_s2, 4  ;;  %s1180_s21 = int_to_ptr.vmem [resolvable:$true] %s1179_s21 }
  0x3d   :  { %v1389_v62 = vpack.c.bf16 %v70_v56, %v69_v55  ;;  %v1393_v1 = vpack.c.bf16 %v520_v0, %v519_v63  ;;  %v1200_v2 = vld [vmem:[#allocation7 + $0x68] ss:$0 sm:$0xff]  ;;  %vm1399_vm9 = vmpackc.low %vm610_vm8, %vm610_vm8  ;;  %v521_v17 = vld [vmem:[#allocation7 + $0x80] sm:$0x1]  ;;  %s1504_s22 = scalar_lea.vmem %s1180_s21, 16  ;;  %s1508_s23 = scalar_lea.vmem %s1180_s21, 32 }
  0x3e   :  { %1368 = vmatpush3.bf16.msra.mxu0 %v1365_v6  ;;  %v934_v45 = vld [vmem:[#allocation7 + $0xb0] sm:$0xff]  ;;  %vm1412_vm14 = vmpackc.low %vm1019_vm12, %vm1540_vm13  ;;  %v935_v55 = vld [vmem:[#allocation7 + $0xb8] sm:$0x1]  ;;  %p1505_p10 = scmp.ne.s32.totalorder %s1180_s21, %s1504_s22  ;;  %p1509_p11 = scmp.lt.s32.totalorder %s1180_s21, %s1180_s21 }
  0x3f   :  { %1374 = vmatprep.subr.bf16.mxu0 %v1373_v28  ;;  %p1510_p12 = scmp.lt.s32.totalorder %s1508_s23, %s1504_s22 }
  0x41   :  { %1271 = vmatmul.mubr.msk.f32.vlgmr.msra.gmra.mrb[0].mxu0 %vm76_vm0, %v1618_v7  ;;  %p1511_p13 = por %p1510_p12, %p1509_p11 }
  0x42   :  { %1376 = vmatpush3.bf16.msra.mxu0 %v1373_v28  ;;  %v523_v28 = vld [vmem:[#allocation7 + $0x90] sm:$0xff] }
  0x43   :  { %1394 = vmatprep.subr.bf16.mxu0 %v1393_v1  ;;  %p1512_p0 = pnand %p1511_p13, %p1505_p10 }
 0x114   :  { %v1272_v10 = vpop.f32.mrb[0].mxu0 }
 0x115   :  { %v159_v11 = vmax.f32 %v1272_v10, 0.0  ;;  %v149_v12 = vpop.f32.mrb[1].mxu0 }
 0x116   :  { %v158_v13 = vmax.f32 %v149_v12, 0.0 }
 0x118   :  { %v1370_v14 = vpack.c.bf16 %v159_v11, %v158_v13 }
 0x11a   :  { %1372 = vmatpush3.bf16.xpose.msk.msra.mxu1 %vm1371_vm3, %v1370_v14 }
 0x11b   :  { %1378 = vmatprep.subr.bf16.mxu1 %v1377_v43 }
 0x121   :  { %1278 = vmatmul.mubr.msk.f32.vlgmr.msra.gmra.mrb[0].mxu1 %vm160_vm2, %v66_v15 }
 0x122   :  { %1380 = vmatpush3.bf16.msra.mxu1 %v1377_v43 }
 0x123   :  { %1382 = vmatprep.subr.bf16.mxu1 %v1381_v46 }
 0x126   :  { %1384 = vmatpush3.bf16.msra.mxu1 %v1381_v46  ;;  %v526_v46 = vld [vmem:[#allocation7 + $0xa8] sm:$0x1] }
 0x127   :  { %1386 = vmatprep.subr.bf16.mxu1 %v1385_v49 }
 0x1f4   :  { %v236_v21 = vpop.f32.mrb[0].mxu1 }
 0x1f5   :  { %v243_v22 = vrot.slane %v236_v21, %v242_v18  ;;  %v1279_v23 = vpop.f32.mrb[1].mxu1 }
 0x1f7   :  { %v244_v24 = vsel %vm60_vm4, %v243_v22, -1e+30  ;;  %v245_v26 = vsel %vm61_vm5, %v243_v22, -1e+30 }
 0x1f8   :  { %v246_v25 = vsel %vm160_vm2, %v244_v24, -inf  ;;  %v249_v27 = vsel %vm160_vm2, %v245_v26, -inf }
 0x1f9   :  { %247 = vmax.xlane.f32.xlu0 %v246_v25 }
 0x1fd   :  { %250 = vmax.xlane.f32.xlu0 %v249_v27  ;;  %v522_v27 = vld [vmem:[#allocation7 + $0x88] sm:$0xff] }
 0x286   :  { %v248_v29 = vpop.xlane.xlu0 %247 }
 0x287   :  { %v252_v30 = vsub.f32 %v244_v24, %v248_v29 }
 0x289   :  { %v254_v31 = vmul.f32 1.442695, %v252_v30 }
 0x28a   :  { %v251_v32 = vpop.xlane.xlu0 %250 }
 0x28b   :  { %1426 = vpow2.f32 %v254_v31  ;;  %v253_v33 = vsub.f32 %v245_v26, %v251_v32  ;;  %v1408_v31 = vpack.c.bf16 %v523_v28, %v522_v27 }
 0x28d   :  { %v256_v34 = vmul.f32 1.442695, %v253_v33 }
 0x28f   :  { %1428 = vpow2.f32 %v256_v34 }
 0x295   :  { %v1427_v35 = vpop.eup %1426 }
 0x296   :  { %v258_v36 = vmul.f32 %v1427_v35, %v58_v19  ;;  %v524_v35 = vld [vmem:[#allocation7 + $0x98] sm:$0xff] }
 0x298   :  { %1284 = vmatprep.mubr.msk.f32.mxu0 %vm160_vm2, %v258_v36  ;;  %v260_v37 = vsel %vm160_vm2, %v258_v36, 0.0 }
 0x299   :  { %v1429_v38 = vpop.eup %1428  ;;  %261 = vadd.xlane.f32.xlu1 %v260_v37 }
 0x29a   :  { %v259_v39 = vmul.f32 %v1429_v38, %v1628_v20 }
 0x29c   :  { %1285 = vmatmul.mubr.msk.f32.vlgmr.msra.gmra.mrb[2].mxu0 %vm160_vm2, %v259_v39  ;;  %v263_v40 = vsel %vm160_vm2, %v259_v39, 0.0 }
 0x29d   :  { %264 = vadd.xlane.f32.xlu1 %v263_v40  ;;  %1396 = vmatpush3.bf16.msra.mxu0 %v1393_v1  ;;  %v940_v1 = vld [vmem:[#allocation7 + $0xe0] sm:$0x1] }
 0x29e   :  { %1397 = vmatprep.subr.bf16.mxu0 %v1537_v8 }
 0x326   :  { %v262_v50 = vpop.xlane.xlu1 %261 }
 0x327   :  { %vm347_vm6 = vcmp.gt.f32.partialorder %v262_v50, 0.0 }
 0x328   :  { %v349_v52 = vsel %vm347_vm6, %v262_v50, 1.0 }
 0x329   :  { %1430 = vrcp.f32 %v349_v52  ;;  %v936_v52 = vld [vmem:[#allocation7 + $0xc0] sm:$0xff] }
 0x32a   :  { %v265_v51 = vpop.xlane.xlu1 %264 }
 0x32b   :  { %vm348_vm7 = vcmp.gt.f32.partialorder %v265_v51, 0.0 }
 0x32c   :  { %v350_v53 = vsel %vm348_vm7, %v265_v51, 1.0 }
 0x32d   :  { %1432 = vrcp.f32 %v350_v53  ;;  %v937_v53 = vld [vmem:[#allocation7 + $0xc8] sm:$0x3] }
 0x333   :  { %v1431_v57 = vpop.eup %1430 }
 0x337   :  { %v1433_v59 = vpop.eup %1432 }
 0x36f   :  { %v1286_v54 = vpop.f32.mrb[2].mxu0 }
 0x370   :  { %v338_v58 = vpop.f32.mrb[3].mxu0  ;;  %v354_v61 = vmul.f32 %v1433_v59, %v1286_v54  ;;  %v1411_v54 = vpack.c.bf16 %v937_v53, %v936_v52 }
 0x371   :  { %v353_v60 = vmul.f32 %v1431_v57, %v338_v58 }
 0x373   :  { %1295 = vmatprep.mubr.msk.f32.mxu1 %vm76_vm0, %v353_v60  ;;  %v939_v60 = vld [vmem:[#allocation7 + $0xd8] sm:$0x3] }
 0x374   :  { %1296 = vmatmul.mubr.msk.f32.vlgmr.msra.gmra.mrb[2].mxu1 %vm76_vm0, %v354_v61  ;;  %v938_v61 = vld [vmem:[#allocation7 + $0xd0] sm:$0x1] }
 0x375   :  { %1388 = vmatpush3.bf16.msra.mxu1 %v1385_v49  ;;  %1306 = vmatprep.mubr.msk.f32.mxu1 %vm76_vm0, %v1614_v5 }
 0x376   :  { %1390 = vmatprep.subr.bf16.mxu1 %v1389_v62 }
 0x379   :  { %1392 = vmatpush3.bf16.msra.mxu1 %v1389_v62 }
 0x37a   :  { %1404 = vmatprep.subr.bf16.mxu1 %v1537_v8 }
 0x37c   :  { %1307 = vmatmul.mubr.msk.f32.vlgmr.msra.gmra.mrb[2].mxu1 %vm76_vm0, %v1618_v7  ;;  %vm1094_vm0 = vcmask 15360  }
 0x37d   :  { %1334 = vmatprep.mubr.msk.f32.mxu1 %vm1538_vm1, %v1539_v9 }
 0x44f   :  { %v1308_v3 = vpop.f32.mrb[2].mxu1 }
 0x450   :  { %v516_v4 = vadd.f32 %v1308_v3, %v1200_v2  ;;  %v502_v5 = vpop.f32.mrb[3].mxu1 }
 0x451   :  { %v515_v6 = vadd.f32 %v1200_v2, %v502_v5 }
 0x452   :  { %v518_v10 = vmax.f32 %v516_v4, 0.0 }
 0x453   :  { %v517_v11 = vmax.f32 %v515_v6, 0.0 }
 0x454   :  { %v859_v34 = vrot.slane %v518_v10, 6 }
 0x455   :  { %v1402_v12 = vpack.c.bf16 %v518_v10, %v517_v11  ;;  %1313 = vmatprep.mubr.msk.f32.mxu0 %vm160_vm2, %v517_v11 }
 0x456   :  { %1314 = vmatmul.mubr.msk.f32.vlgmr.msra.gmra.mrb[4].mxu0 %vm160_vm2, %v518_v10 }
 0x457   :  { %1320 = vmatprep.mubr.msk.f32.mxu0 %vm1538_vm1, %v1539_v9 }
 0x529   :  { %v1315_v7 = vpop.f32.mrb[4].mxu0 }
 0x52a   :  { %v609_v13 = vmax.f32 %v1315_v7, 0.0  ;;  %v599_v14 = vpop.f32.mrb[5].mxu0 }
 0x52b   :  { %v608_v15 = vmax.f32 %v599_v14, 0.0 }
 0x52d   :  { %v1398_v16 = vpack.c.bf16 %v609_v13, %v608_v15 }
 0x52f   :  { %1400 = vmatpush3.bf16.xpose.msk.msra.mxu0 %vm1399_vm9, %v1398_v16 }
 0x530   :  { %1401 = vmatprep.subr.bf16.mxu0 %v1537_v8 }
 0x536   :  { %1321 = vmatmul.mubr.msk.f32.vlgmr.msra.gmra.mrb[6].mxu0 %vm610_vm8, %v521_v17 }
 0x537   :  { %1403 = vmatpush3.bf16.msra.mxu0 %v1402_v12  ;;  %1327 = vmatprep.mubr.msk.f32.mxu0 %vm1538_vm1, %v1539_v9 }
 0x538   :  { %1407 = vmatprep.subr.bf16.mxu0 %v1537_v8 }
 0x609   :  { %v686_v18 = vpop.f32.mrb[6].mxu0 }
 0x60a   :  { %v691_v19 = vrot.slane %v686_v18, 2  ;;  %v1322_v21 = vpop.f32.mrb[7].mxu0 }
 0x60c   :  { %v693_v22 = vsel %vm61_vm5, %v691_v19, -1e+30 }
 0x60d   :  { %v695_v23 = vsel %vm694_vm10, %v693_v22, -inf }
 0x60e   :  { %696 = vmax.xlane.f32.xlu0 %v695_v23 }
 0x69b   :  { %v697_v24 = vpop.xlane.xlu0 %696 }
 0x69c   :  { %v698_v25 = vsub.f32 %v693_v22, %v697_v24 }
 0x69e   :  { %v699_v26 = vmul.f32 1.442695, %v698_v25 }
 0x6a0   :  { %1434 = vpow2.f32 %v699_v26 }
 0x6aa   :  { %v1435_v29 = vpop.eup %1434 }
 0x6ab   :  { %v701_v30 = vmul.f32 %v1435_v29, %v1628_v20  ;;  %v525_v20 = vld [vmem:[#allocation7 + $0xa0] sm:$0xff] }
 0x6ac   :  { %v1405_v36 = vpack.c.bf16 %v525_v20, %v524_v35 }
 0x6ad   :  { %v702_v32 = vsel %vm694_vm10, %v701_v30, 0.0  ;;  %v706_v33 = vrot.slane %v701_v30, 6 }
 0x6ae   :  { %703 = vadd.xlane.f32.xlu1 %v702_v32  ;;  %1406 = vmatpush3.bf16.msra.mxu1 %v1405_v36 }
 0x6af   :  { %1328 = vmatmul.mubr.msk.f32.vlgmr.msra.gmra.mrb[8].mxu0 %vm160_vm2, %v706_v33  ;;  %1344 = vmatprep.subr.mxu1 %v1539_v9 }
 0x6b0   :  { %1409 = vmatpush3.bf16.msra.mxu0 %v1408_v31  ;;  %1341 = vmatprep.mubr.msk.f32.mxu0 %vm1538_vm1, %v1539_v9 }
 0x6b1   :  { %1410 = vmatprep.subr.bf16.mxu0 %v1537_v8 }
 0x6b3   :  { %1342 = vmatmul.mubr.msk.f32.vlgmr.msra.gmra.mrb[10].mxu0 %vm160_vm2, %v859_v34 }
 0x6b4   :  { %1353 = vmatprep.mubr.msk.f32.mxu0 %vm1538_vm1, %v1539_v9  ;;  %1413 = vmatpush3.bf16.msk.msra.mxu0 %vm1412_vm14, %v1411_v54 }
 0x73b   :  { %v704_v37 = vpop.xlane.xlu1 %703 }
 0x73c   :  { %vm779_vm11 = vcmp.gt.f32.partialorder %v704_v37, 0.0 }
 0x73d   :  { %v780_v38 = vsel %vm779_vm11, %v704_v37, 1.0 }
 0x73e   :  { %1436 = vrcp.f32 %v780_v38 }
 0x748   :  { %v1437_v39 = vpop.eup %1436 }
 0x749   :  { %v783_v40 = vrot.slane %v1437_v39, 6 }
 0x782   :  { %v775_v41 = vpop.f32.mrb[8].mxu0 }
 0x783   :  { %v785_v42 = vmul.f32 %v783_v40, %v775_v41  ;;  %v1329_v8 = vpop.f32.mrb[9].mxu0 }
 0x785   :  { %1335 = vmatmul.mubr.msk.f32.vlgmr.msra.gmra.mrb[4].mxu1 %vm160_vm2, %v785_v42 }
 0x786   :  { %v928_v43 = vpop.f32.mrb[10].mxu0  ;;  %1346 = vmatprep.mubr.msk.f32.mxu1 %vm1538_vm1, %v1539_v9  ;;  %1345 = vmatpush3.msra.mxu1 %v934_v45 }
 0x787   :  { %v1343_v44 = vpop.f32.mrb[11].mxu0  ;;  %1356 = vmatprep.subr.mxu1 %v1539_v9 }
 0x858   :  { %v855_v47 = vpop.f32.mrb[4].mxu1 }
 0x859   :  { %v929_v48 = vadd.f32 %v928_v43, %v855_v47  ;;  %v1336_v49 = vpop.f32.mrb[5].mxu1 }
 0x85b   :  { %v932_v50 = vadd.f32 %v929_v48, %v526_v46 }
 0x85d   :  { %v933_v51 = vmax.f32 %v932_v50, 0.0 }
 0x85f   :  { %1347 = vmatmul.mubr.msk.f32.vlgmr.msra.gmra.mrb[6].mxu1 %vm610_vm8, %v933_v51 }
 0x860   :  { %1358 = vmatprep.mubr.msk.f32.mxu1 %vm1538_vm1, %v1539_v9  ;;  %1357 = vmatpush3.msk.msra.mxu1 %vm1019_vm12, %v939_v60  ;;  %vm1171_vm1 = vcmask 0  }
 0x932   :  { %v1010_v56 = vpop.f32.mrb[6].mxu1 }
 0x933   :  { %v1011_v57 = vadd.f32 %v1010_v56, %v935_v55  ;;  %v1348_v58 = vpop.f32.mrb[7].mxu1 }
 0x935   :  { %v1014_v59 = vmax.f32 %v1011_v57, 0.0 }
 0x937   :  { %1354 = vmatmul.mubr.msk.f32.vlgmr.msra.gmra.mrb[12].mxu0 %vm1015_vm15, %v1014_v59 }
 0xa0a   :  { %v1089_v62 = vpop.f32.mrb[12].mxu0 }
 0xa0b   :  { %v1090_v63 = vadd.f32 %v1089_v62, %v938_v61  ;;  %v1355_v9 = vpop.f32.mrb[13].mxu0 }
 0xa0d   :  { %v1093_v0 = vmax.f32 %v1090_v63, 0.0 }
 0xa0f   :  { %1359 = vmatmul.mubr.msk.f32.vlgmr.msra.gmra.mrb[8].mxu1 %vm1094_vm0, %v1093_v0 }
 0xae2   :  { %v1167_v2 = vpop.f32.mrb[8].mxu1 }
 0xae3   :  { %v1168_v3 = vadd.f32 %v1167_v2, %v940_v1  ;;  %v1360_v4 = vpop.f32.mrb[9].mxu1 }
 0xae5   :  { %1172 = vst.msk [vmem:[#allocation8] sm:$0x1] %vm1171_vm1, %v1168_v3 }
 0xae6   :  { %1515 = shalt.err (!%p1512_p0)
}
 0xae7   :  { %s1516_s26 = scalar_lea.hbm %s1696_s3, 16 }
 0xae8   :  { %p1517_p1 = scmp.ne.s32.totalorder %s1696_s3, %s1516_s26  ;;  %p1520_p2 = scmp.lt.u32.totalorder %s1516_s26, %s1696_s3 }
 0xaea   :  { %p1522_p3 = pnand %p1520_p2, %p1517_p1 }
 0xaec   :  { %1525 = shalt.err (!%p1522_p3)
}
 0xaed   :  { %1182 = dma.vmem_to_hbm [thread:$0]  %s1180_s21, 16, %s1696_s3, [#allocation4]  }
 0xaee   :  { %1530 = dma.done.wait [#allocation4], 16  }
 0xaef   :  { %1531 = vsyncadd [#allocation4], 4294967280 }
 0xaf0   :  { %1186 = vsyncpa [#allocation3], 1 }
 0xaf1   :  { %1187 = vsyncpa [#allocation6], 1 }
 0xaf2   :  { %1188 = vsyncpa [#allocation4], 1 }

</bundles_post_ra>
